<compile_context>
chip_gen: v7x
topology: tpu7x:2x2x1
jax: 0.10.0
libtpu: 0.0.40
codegen_flags: <defaults>
</compile_context>

<pallas_src>
import functools

import numpy as np
import jax
import jax.numpy as jnp
from jax.experimental import pallas as pl
from jax.experimental.pallas import tpu as pltpu


OPERATIONS_DICT = {
    "I": np.array([[1, 0], [0, 1]], dtype=np.complex64),
    "X": np.array([[0, 1], [1, 0]], dtype=np.complex64),
    "Y": np.array([[0, -1j], [1j, 0]], dtype=np.complex64),
    "Z": np.array([[1, 0], [0, -1]], dtype=np.complex64),
}


def _rotation_kernel(imat, pauli_r, pauli_i, theta_ref, x_ref, o_ref):
    """Fused rot_matrices + batched single-qubit gate application (one lane tile).

    theta_ref : (B, 1)         f32  per-sublane-row angles (broadcast along lanes)
    x_ref     : (2, 2, B, T)   f32  state block: (target, re/im, sublane, lane)
    o_ref     : (2, 2, B, T)   f32  output block (aliased with the input in HBM)

    imat / pauli_r / pauli_i are 2x2 Python constants baked in at trace time.
    """
    half = theta_ref[...] * 0.5            # (B, 1)
    ct = jnp.cos(half)                     # (B, 1) -- EUP, once per tile
    st = jnp.sin(half)                     # (B, 1)

    # Hoisted loads: each state plane is read from VMEM exactly once per tile.
    s_r = (x_ref[0, 0], x_ref[1, 0])       # each (B, T)
    s_i = (x_ref[0, 1], x_ref[1, 1])

    def coeff(a, c):
        # R[a,c] = ct*I[a,c] - 1j*st*P[a,c]
        #   Re = ct*I[a,c] + st*Im(P)[a,c]
        #   Im = -st*Re(P)[a,c]
        # Constant-folded at trace time; identically-zero parts return None.
        i_ac = float(imat[a, c])
        pr_ac = float(pauli_r[a, c])
        pi_ac = float(pauli_i[a, c])
        re = None
        if i_ac != 0.0:
            re = ct if i_ac == 1.0 else i_ac * ct
        if pi_ac != 0.0:
            t = st if pi_ac == 1.0 else (-st if pi_ac == -1.0 else pi_ac * st)
            re = t if re is None else re + t
        im = None
        if pr_ac != 0.0:
            im = -st if pr_ac == 1.0 else (st if pr_ac == -1.0 else (-pr_ac) * st)
        return re, im

    for a in range(2):
        out_r = None
        out_i = None
        for c in range(2):
            re, im = coeff(a, c)
            if re is not None:
                tr = re * s_r[c]
                ti = re * s_i[c]
                out_r = tr if out_r is None else out_r + tr
                out_i = ti if out_i is None else out_i + ti
            if im is not None:
                tr = im * s_i[c]
                ti = im * s_r[c]
                out_r = (-tr) if out_r is None else out_r - tr
                out_i = ti if out_i is None else out_i + ti
        # out_r / out_i are never None: coeff(a, a) always contributes ct.
        o_ref[a, 0, :, :] = out_r
        o_ref[a, 1, :, :] = out_i


def _pick_lr_tile(lr_lanes: int, b_sub: int, max_block_bytes: int = 2 << 20) -> int:
    """Pick the lane-tile width for the 1-D grid over the flattened non-target axis.

    Blocks are (2, 2, b_sub, tile) f32.  Target ~2 MiB blocks (>=85% of the HBM
    roofline; 2 streams x 2 pipeline buffers x 2 MiB = 8 MiB VMEM, safe within
    v5e's 16 MiB default scoped VMEM and v7x's 64 MiB physical VMEM), but always
    keep >= 2 grid steps when the axis allows it so dimension_semantics="parallel"
    can shard tiles across v7x's two TensorCores.
    """
    if lr_lanes < 256:
        return lr_lanes                    # single full-width (still lane-aligned) block
    tile = lr_lanes // 2                   # >= 2 grid steps for the v7x 2-TC split
    bytes_per_lane = 2 * 2 * b_sub * 4
    while tile > 128 and tile * bytes_per_lane > max_block_bytes:
        tile //= 2
    return tile                            # power of two >= 128, divides lr_lanes


class RotationGate:
    """Pallas-TPU port of pyqtorch.modules.parametric.RotationGate."""

    n_params = 1

    def __init__(self, gate: str, qubits, n_qubits: int):
        self.gate = gate
        self.qubits = list(qubits)
        self.n_qubits = n_qubits
        # Deterministic "buffers" (same role as register_buffer in the torch module).
        self.imat = np.real(OPERATIONS_DICT["I"]).astype(np.float32)
        self.pauli_r = np.real(OPERATIONS_DICT[gate]).astype(np.float32)
        self.pauli_i = np.imag(OPERATIONS_DICT[gate]).astype(np.float32)

    def forward(self, state: jax.Array, thetas: jax.Array, *, lr_tile: int | None = None) -> jax.Array:
        # state : complex64, shape (2,)*n_qubits + (batch,)
        # thetas: float32,  shape (batch,) or (1, batch)
        thetas = jnp.asarray(thetas)
        theta = thetas[0] if thetas.ndim == 2 else thetas        # torch: squeeze(0) if ndim==2
        theta = jnp.reshape(theta, (-1,)).astype(jnp.float32)
        batch = theta.shape[0]

        q = int(self.qubits[0])
        n = self.n_qubits
        lr = 2 ** (n - 1)

        # --- sublane packing: fold K LR-chunks into the sublane axis when batch < 8
        k = 1
        if batch < 8:
            k = max(1, 8 // batch)
            k = 1 << (k.bit_length() - 1)          # round down to power of two
            k = min(k, lr)
        b_sub = batch * k
        lr_lanes = lr // k

        if lr_tile is None:
            lr_tile = _pick_lr_tile(lr_lanes, b_sub)
        assert lr_lanes % lr_tile == 0, "lr_tile must divide the packed lane axis"
        assert lr_tile == lr_lanes or lr_tile % 128 == 0, "sub-tiles must be lane-aligned (x128)"

        # --- single fused planar layout: (target=2, re/im=2, sublane-batch, lanes)
        # TODO(synk): jax.lax.bitcast_convert_type rejects complex dtypes, so the free
        # reinterpret is emulated by one stacked real/imag pass + one transpose; a
        # persistent planar state layout across gates would eliminate these copies.
        planar = jnp.stack((jnp.real(state), jnp.imag(state)), axis=0).astype(jnp.float32)
        # planar axes: (re/im, qubit_0 .. qubit_{n-1}, batch)
        perm = (1 + q, 0, 1 + n) + tuple(1 + ax for ax in range(n) if ax != q)
        x = jnp.transpose(planar, perm).reshape(2, 2, batch, lr)
        x = x.reshape(2, 2, b_sub, lr_lanes)                      # free (row-major) repack
        theta_col = jnp.repeat(theta, k).reshape(b_sub, 1)        # theta per sublane row

        # VMEM budget: 2 streams x 2 pipeline buffers x block (+ slack).  Only set an
        # explicit limit when we would exceed v5e's 16 MiB default scoped VMEM.
        block_bytes = 2 * 2 * b_sub * lr_tile * 4
        needed = 4 * block_bytes + (2 << 20)
        vmem_limit = min(needed, 48 << 20) if needed > (16 << 20) else None

        kernel = functools.partial(_rotation_kernel, self.imat, self.pauli_r, self.pauli_i)

        out = pl.pallas_call(
            kernel,
            grid=(lr_lanes // lr_tile,),
            in_specs=[
                pl.BlockSpec((b_sub, 1), lambda j: (0, 0)),
                pl.BlockSpec((2, 2, b_sub, lr_tile), lambda j: (0, 0, 0, j)),
            ],
            out_specs=pl.BlockSpec((2, 2, b_sub, lr_tile), lambda j: (0, 0, 0, j)),
            out_shape=jax.ShapeDtypeStruct((2, 2, b_sub, lr_lanes), jnp.float32),
            input_output_aliases={1: 0},          # in-place: block j only rewrites block j
            compiler_params=pltpu.CompilerParams(
                dimension_semantics=("parallel",),  # v7x: shard LR tiles over 2 TCs
                vmem_limit_bytes=vmem_limit,
            ),
        )(theta_col, x)

        # --- recombine + restore the original (2,)*n + (batch,) complex layout
        out = out.reshape((2, 2, batch) + (2,) * (n - 1))         # undo packing (free)
        inv_perm = [0] * (n + 2)
        for i, p in enumerate(perm):
            inv_perm[p] = i
        out = jnp.transpose(out, inv_perm)                        # (re/im,) + (2,)*n + (batch,)
        return jax.lax.complex(out[0], out[1])                    # complex64

    def __call__(self, state, thetas, **kw):
        return self.forward(state, thetas, **kw)


def _reference(state, thetas, gate_name, q, n_qubits):
    """Plain-JAX mirror of rot_matrices + _apply_batch_gate."""
    theta = thetas[0] if thetas.ndim == 2 else thetas
    P = jnp.asarray(OPERATIONS_DICT[gate_name])
    I2 = jnp.eye(2, dtype=jnp.complex64)
    M = (
        jnp.cos(theta / 2)[None, None, :] * I2[:, :, None]
        - 1j * jnp.sin(theta / 2)[None, None, :] * P[:, :, None]
    ).astype(jnp.complex64)                                       # (2, 2, batch)
    batch = theta.shape[0]
    moved = jnp.moveaxis(state, q, 0).reshape(2, 2 ** (n_qubits - 1), batch)
    ref = jnp.einsum("acb,cnb->anb", M, moved)
    ref = jnp.moveaxis(ref.reshape((2,) * n_qubits + (batch,)), 0, q)
    return ref


def _make_inputs(key, n_qubits, batch):
    k1, k2, k3 = jax.random.split(key, 3)
    shape = (2,) * n_qubits + (batch,)
    state_r = jax.random.normal(k1, shape, dtype=jnp.float32)
    state_i = jax.random.normal(k2, shape, dtype=jnp.float32)
    state = jax.lax.complex(state_r, state_i)
    norm = jnp.sqrt(
        jnp.sum(jnp.abs(state) ** 2, axis=tuple(range(n_qubits)), keepdims=True)
    )
    state = state / norm
    thetas = jax.random.uniform(
        k3, (1, batch), dtype=jnp.float32, minval=0.0, maxval=2.0 * np.pi
    )
    return state, thetas


if __name__ == "__main__":
    key = jax.random.PRNGKey(0)
    # (n_qubits, batch, gate, target_qubit, lr_tile override)
    configs = [
        (4, 8, "Y", 1, None),     # tiny, single block
        (5, 2, "X", 0, None),     # batch<8 -> sublane packing (K=4)
        (9, 1, "Y", 8, None),     # batch=1 -> K=8, target is the last qubit
        (10, 8, "Z", 6, None),    # auto tile 256 -> grid=(2,) (v7x 2-TC split path)
        (10, 8, "Z", 3, 128),     # forced 128-lane tiles -> grid=(4,)
    ]

    for (n_qubits, batch, gate_name, q, tile) in configs:
        key, sub = jax.random.split(key)
        state, thetas = _make_inputs(sub, n_qubits, batch)

        gate = RotationGate(gate_name, [q], n_qubits)
        fwd = jax.jit(functools.partial(gate.forward, lr_tile=tile))
        out = jax.block_until_ready(fwd(state, thetas))

        ref = _reference(state, thetas, gate_name, q, n_qubits)
        assert out.shape == state.shape and out.dtype == state.dtype
        np.testing.assert_allclose(np.asarray(out), np.asarray(ref), atol=1e-5, rtol=1e-5)

    print("KERNEL_OK")
</pallas_src>

<mosaic_0001>
module attributes {stable_mosaic.version = 11 : i64} {
  func.func @_rotation_kernel(%arg0: i32, %arg1: memref<8x1xf32, #tpu.memory_space<vmem>>, %arg2: memref<2x2x8x8xf32, #tpu.memory_space<vmem>>, %arg3: memref<2x2x8x8xf32, #tpu.memory_space<vmem>>) attributes {dimension_semantics = [#tpu.dimension_semantics<parallel>], iteration_bounds = array<i64: 1>, scalar_prefetch = 0 : i64, scratch_operands = 0 : i64, tpu.core_type = #tpu.core_type<tc>, window_params = [{pipeline_mode = #tpu.pipeline_mode<synchronous>, transform_indices = @transform_0, window_bounds = array<i64: 8, 1>}, {transform_indices = @transform_1, window_bounds = array<i64: 2, 2, 8, 8>}, {transform_indices = @transform_2, window_bounds = array<i64: 2, 2, 8, 8>}]} {
    %c0 = arith.constant 0 : index
    %c0_0 = arith.constant 0 : index
    %0 = vector.load %arg1[%c0, %c0_0] : memref<8x1xf32, #tpu.memory_space<vmem>>, vector<8x1xf32>
    %cst = arith.constant 5.000000e-01 : f32
    %1 = vector.broadcast %cst : f32 to vector<8x1xf32>
    %2 = arith.mulf %0, %1 : vector<8x1xf32>
    %3 = math.cos %2 : vector<8x1xf32>
    %4 = math.sin %2 : vector<8x1xf32>
    %c0_1 = arith.constant 0 : index
    %c0_2 = arith.constant 0 : index
    %c0_3 = arith.constant 0 : index
    %c0_4 = arith.constant 0 : index
    %5 = vector.load %arg2[%c0_1, %c0_2, %c0_3, %c0_4] : memref<2x2x8x8xf32, #tpu.memory_space<vmem>>, vector<1x1x8x8xf32>
    %6 = vector.shape_cast %5 : vector<1x1x8x8xf32> to vector<8x8xf32>
    %c1 = arith.constant 1 : index
    %c0_5 = arith.constant 0 : index
    %c0_6 = arith.constant 0 : index
    %c0_7 = arith.constant 0 : index
    %7 = vector.load %arg2[%c1, %c0_5, %c0_6, %c0_7] : memref<2x2x8x8xf32, #tpu.memory_space<vmem>>, vector<1x1x8x8xf32>
    %8 = vector.shape_cast %7 : vector<1x1x8x8xf32> to vector<8x8xf32>
    %c0_8 = arith.constant 0 : index
    %c1_9 = arith.constant 1 : index
    %c0_10 = arith.constant 0 : index
    %c0_11 = arith.constant 0 : index
    %9 = vector.load %arg2[%c0_8, %c1_9, %c0_10, %c0_11] : memref<2x2x8x8xf32, #tpu.memory_space<vmem>>, vector<1x1x8x8xf32>
    %10 = vector.shape_cast %9 : vector<1x1x8x8xf32> to vector<8x8xf32>
    %c1_12 = arith.constant 1 : index
    %c1_13 = arith.constant 1 : index
    %c0_14 = arith.constant 0 : index
    %c0_15 = arith.constant 0 : index
    %11 = vector.load %arg2[%c1_12, %c1_13, %c0_14, %c0_15] : memref<2x2x8x8xf32, #tpu.memory_space<vmem>>, vector<1x1x8x8xf32>
    %12 = vector.shape_cast %11 : vector<1x1x8x8xf32> to vector<8x8xf32>
    %13 = vector.broadcast %3 : vector<8x1xf32> to vector<8x8xf32>
    %14 = arith.mulf %13, %6 : vector<8x8xf32>
    %15 = vector.broadcast %3 : vector<8x1xf32> to vector<8x8xf32>
    %16 = arith.mulf %15, %10 : vector<8x8xf32>
    %cst_16 = arith.constant 0.000000e+00 : f32
    %17 = vector.broadcast %cst_16 : f32 to vector<8x1xf32>
    %18 = arith.subf %17, %4 : vector<8x1xf32>
    %19 = vector.broadcast %18 : vector<8x1xf32> to vector<8x8xf32>
    %20 = arith.mulf %19, %8 : vector<8x8xf32>
    %21 = vector.broadcast %18 : vector<8x1xf32> to vector<8x8xf32>
    %22 = arith.mulf %21, %12 : vector<8x8xf32>
    %23 = arith.addf %14, %20 : vector<8x8xf32>
    %24 = arith.addf %16, %22 : vector<8x8xf32>
    %c0_17 = arith.constant 0 : index
    %c0_18 = arith.constant 0 : index
    %c0_19 = arith.constant 0 : index
    %c0_20 = arith.constant 0 : index
    %25 = vector.load %arg3[%c0_17, %c0_18, %c0_19, %c0_20] : memref<2x2x8x8xf32, #tpu.memory_space<vmem>>, vector<1x1x8x8xf32>
    %26 = vector.shape_cast %25 : vector<1x1x8x8xf32> to vector<8x8xf32>
    %27 = vector.shape_cast %23 : vector<8x8xf32> to vector<1x1x8x8xf32>
    tpu.vector_store %arg3[%c0_17, %c0_18, %c0_19, %c0_20], %27 {strides = array<i32>} : memref<2x2x8x8xf32, #tpu.memory_space<vmem>>, vector<1x1x8x8xf32>,
    %c0_21 = arith.constant 0 : index
    %c1_22 = arith.constant 1 : index
    %c0_23 = arith.constant 0 : index
    %c0_24 = arith.constant 0 : index
    %28 = vector.load %arg3[%c0_21, %c1_22, %c0_23, %c0_24] : memref<2x2x8x8xf32, #tpu.memory_space<vmem>>, vector<1x1x8x8xf32>
    %29 = vector.shape_cast %28 : vector<1x1x8x8xf32> to vector<8x8xf32>
    %30 = vector.shape_cast %24 : vector<8x8xf32> to vector<1x1x8x8xf32>
    tpu.vector_store %arg3[%c0_21, %c1_22, %c0_23, %c0_24], %30 {strides = array<i32>} : memref<2x2x8x8xf32, #tpu.memory_space<vmem>>, vector<1x1x8x8xf32>,
    %31 = vector.broadcast %4 : vector<8x1xf32> to vector<8x8xf32>
    %32 = arith.mulf %31, %6 : vector<8x8xf32>
    %33 = vector.broadcast %4 : vector<8x1xf32> to vector<8x8xf32>
    %34 = arith.mulf %33, %10 : vector<8x8xf32>
    %35 = vector.broadcast %3 : vector<8x1xf32> to vector<8x8xf32>
    %36 = arith.mulf %35, %8 : vector<8x8xf32>
    %37 = vector.broadcast %3 : vector<8x1xf32> to vector<8x8xf32>
    %38 = arith.mulf %37, %12 : vector<8x8xf32>
    %39 = arith.addf %32, %36 : vector<8x8xf32>
    %40 = arith.addf %34, %38 : vector<8x8xf32>
    %c1_25 = arith.constant 1 : index
    %c0_26 = arith.constant 0 : index
    %c0_27 = arith.constant 0 : index
    %c0_28 = arith.constant 0 : index
    %41 = vector.load %arg3[%c1_25, %c0_26, %c0_27, %c0_28] : memref<2x2x8x8xf32, #tpu.memory_space<vmem>>, vector<1x1x8x8xf32>
    %42 = vector.shape_cast %41 : vector<1x1x8x8xf32> to vector<8x8xf32>
    %43 = vector.shape_cast %39 : vector<8x8xf32> to vector<1x1x8x8xf32>
    tpu.vector_store %arg3[%c1_25, %c0_26, %c0_27, %c0_28], %43 {strides = array<i32>} : memref<2x2x8x8xf32, #tpu.memory_space<vmem>>, vector<1x1x8x8xf32>,
    %c1_29 = arith.constant 1 : index
    %c1_30 = arith.constant 1 : index
    %c0_31 = arith.constant 0 : index
    %c0_32 = arith.constant 0 : index
    %44 = vector.load %arg3[%c1_29, %c1_30, %c0_31, %c0_32] : memref<2x2x8x8xf32, #tpu.memory_space<vmem>>, vector<1x1x8x8xf32>
    %45 = vector.shape_cast %44 : vector<1x1x8x8xf32> to vector<8x8xf32>
    %46 = vector.shape_cast %40 : vector<8x8xf32> to vector<1x1x8x8xf32>
    tpu.vector_store %arg3[%c1_29, %c1_30, %c0_31, %c0_32], %46 {strides = array<i32>} : memref<2x2x8x8xf32, #tpu.memory_space<vmem>>, vector<1x1x8x8xf32>,
    return
  }
  func.func @transform_0(%arg0: i32) -> (i32, i32) {
    %c0_i32 = arith.constant 0 : i32
    %c0_i32_0 = arith.constant 0 : i32
    %c0_i32_1 = arith.constant 0 : i32
    return %c0_i32, %c0_i32_0 : i32, i32
  }
  func.func @transform_1(%arg0: i32) -> (i32, i32, i32, i32) {
    %c0_i32 = arith.constant 0 : i32
    %c0_i32_0 = arith.constant 0 : i32
    %c0_i32_1 = arith.constant 0 : i32
    %c0_i32_2 = arith.constant 0 : i32
    return %c0_i32, %c0_i32_0, %c0_i32_1, %arg0 : i32, i32, i32, i32
  }
  func.func @transform_2(%arg0: i32) -> (i32, i32, i32, i32) {
    %c0_i32 = arith.constant 0 : i32
    %c0_i32_0 = arith.constant 0 : i32
    %c0_i32_1 = arith.constant 0 : i32
    %c0_i32_2 = arith.constant 0 : i32
    return %c0_i32, %c0_i32_0, %c0_i32_1, %arg0 : i32, i32, i32, i32
  }
}

</mosaic_0001>

<bundles_post_ra>
// kernel: custom-call.1
= control target key start
LH: loop header
LB: loop body
LE: loop exit
PB: predicated region body
PF: predicated region fallthrough
CT: control target
= control target key end

     0   :  { %s59_s0 = inlined_call_operand.hbm [shape: c64[2,2,2,2,8], index: 0, kind: input, shape index: {}]   ;;  %s60_s1 = inlined_call_operand.vmem [shape: f32[2,2,2,2,8], index: 1, kind: output, shape index: {}]  }
   0x1   :  { %s2_s8 = scalar_lea.hbm %s59_s0, 256 }
   0x2   :  { %3 = vsyncpa [#allocation0], 0  ;;  %s4_s11 = sshll.u32 %s60_s1, 4  ;;  %s34_s14 = scalar_lea.hbm %s59_s0, 512  ;;  %s5_s11 = int_to_ptr.vmem [resolvable:$true] %s4_s11 }
   0x3   :  { %p11_p0 = scmp.ne.s32.totalorder %s2_s8, %s34_s14  ;;  %p13_p1 = scmp.lt.u32.totalorder %s2_s8, %s59_s0 }
   0x4   :  { %p14_p2 = scmp.lt.u32.totalorder %s34_s14, %s34_s14  ;;  %p16_p4 = scmp.lt.u32.totalorder %s34_s14, %s2_s8 }
   0x6   :  { %p15_p3 = por %p14_p2, %p13_p1 }
   0x8   :  { %p17_p5 = por %p16_p4, %p15_p3 }
   0xa   :  { %p18_p6 = pnand %p17_p5, %p11_p0 }
   0xc   :  { %21 = shalt.err (!%p18_p6)  }
   0xd   :  { %s22_s17 = scalar_lea.vmem %s5_s11, 256  ;;  %p27_p8 = scmp.lt.s32.totalorder %s5_s11, %s5_s11 }
   0xe   :  { %p23_p7 = scmp.ne.s32.totalorder %s5_s11, %s22_s17  ;;  %p28_p9 = scmp.lt.s32.totalorder %s22_s17, %s22_s17 }
  0x10   :  { %p29_p10 = por %p28_p9, %p27_p8 }
  0x12   :  { %p30_p11 = pnand %p29_p10, %p23_p7 }
  0x14   :  { %33 = shalt.err (!%p30_p11)  }
  0x15   :  { %7 = dma.hbm_to_vmem [thread:$0]  %s2_s8, 256, %s5_s11, [#allocation0] }
  0x16   :  { %35 = dma.done.wait [#allocation0], 256  }
  0x17   :  { %36 = vsyncadd [#allocation0], 4294967040 }
  0x18   :  { %9 = vsyncpa [#allocation0], 1 }

// kernel: custom-call
= control target key start
LH: loop header
LB: loop body
LE: loop exit
PB: predicated region body
PF: predicated region fallthrough
CT: control target
= control target key end

     0   :  { %2 = vsyncpa [#allocation0], 0  ;;  %s61_s0 = inlined_call_operand.hbm [shape: c64[2,2,2,2,8], index: 0, kind: input, shape index: {}]   ;;  %s62_s1 = inlined_call_operand.vmem [shape: f32[2,2,2,2,8], index: 1, kind: output, shape index: {}]  }
   0x1   :  { %s3_s8 = sshll.u32 %s62_s1, 4  ;;  %s9_s11 = scalar_lea.hbm %s61_s0, 256  ;;  %s4_s8 = int_to_ptr.vmem [resolvable:$true] %s3_s8 }
   0x2   :  { %p10_p0 = scmp.ne.s32.totalorder %s61_s0, %s9_s11  ;;  %s11_s16 = scalar_lea.hbm %s61_s0, 512 }
   0x3   :  { %p12_p1 = scmp.lt.u32.totalorder %s11_s16, %s9_s11  ;;  %p13_p2 = scmp.lt.u32.totalorder %s9_s11, %s61_s0 }
   0x5   :  { %p14_p3 = por %p13_p2, %p12_p1 }
   0x7   :  { %p15_p4 = pnand %p14_p3, %p10_p0 }
   0x9   :  { %18 = shalt.err (!%p15_p4)  }
   0xa   :  { %s19_s1 = scalar_lea.vmem %s4_s8, 256  ;;  %p24_p6 = scmp.lt.s32.totalorder %s4_s8, %s4_s8 }
   0xb   :  { %p20_p5 = scmp.ne.s32.totalorder %s4_s8, %s19_s1  ;;  %p25_p7 = scmp.lt.s32.totalorder %s19_s1, %s19_s1 }
   0xd   :  { %p26_p8 = por %p25_p7, %p24_p6 }
   0xf   :  { %p27_p9 = pnand %p26_p8, %p20_p5 }
  0x11   :  { %30 = shalt.err (!%p27_p9)  }
  0x12   :  { %6 = dma.hbm_to_vmem [thread:$0]  %s61_s0, 256, %s4_s8, [#allocation0] }
  0x13   :  { %31 = dma.done.wait [#allocation0], 256  }
  0x14   :  { %32 = vsyncadd [#allocation0], 4294967040 }
  0x15   :  { %8 = vsyncpa [#allocation0], 1 }

// kernel: custom-call.2
= control target key start
LH: loop header
LB: loop body
LE: loop exit
PB: predicated region body
PF: predicated region fallthrough
CT: control target
= control target key end

     0   :  { %s126_s0 = inlined_call_operand.vmem [shape: f32[2,2,2,2,8], index: 0, kind: input, shape index: {}]   ;;  %s127_s1 = inlined_call_operand.vmem [shape: f32[2,2,2,2,8], index: 1, kind: input, shape index: {}]   ;;  %s128_s2 = inlined_call_operand.hbm [shape: c64[2,2,2,2,8], index: 2, kind: output, shape index: {}]  }
   0x1   :  { %s87_s11 = scalar_lea.hbm %s128_s2, 256 }
   0x2   :  { %4 = vsyncpa [#allocation0], 0  ;;  %s5_s14 = sshll.u32 %s126_s0, 4  ;;  %s6_s14 = int_to_ptr.vmem [resolvable:$true] %s5_s14 }
   0x3   :  { %s18_s15 = scalar_lea.vmem %s6_s14, 256  ;;  %p23_p1 = scmp.lt.s32.totalorder %s6_s14, %s6_s14 }
   0x4   :  { %p19_p0 = scmp.ne.s32.totalorder %s6_s14, %s18_s15  ;;  %p24_p2 = scmp.lt.s32.totalorder %s18_s15, %s18_s15 }
   0x6   :  { %p25_p3 = por %p24_p2, %p23_p1 }
   0x8   :  { %p26_p4 = pnand %p25_p3, %p19_p0 }
   0xa   :  { %29 = shalt.err (!%p26_p4)  }
   0xb   :  { %p31_p5 = scmp.ne.s32.totalorder %s128_s2, %s87_s11  ;;  %s32_s0 = scalar_lea.hbm %s128_s2, 512 }
   0xc   :  { %p33_p6 = scmp.lt.u32.totalorder %s32_s0, %s87_s11  ;;  %p34_p7 = scmp.lt.u32.totalorder %s87_s11, %s128_s2 }
   0xe   :  { %p35_p8 = por %p34_p7, %p33_p6 }
  0x10   :  { %p36_p9 = pnand %p35_p8, %p31_p5 }
  0x12   :  { %39 = shalt.err (!%p36_p9)  }
  0x13   :  { %8 = dma.vmem_to_hbm [thread:$0]  %s6_s14, 256, %s128_s2, [#allocation0] }
  0x14   :  { %65 = dma.done.wait [#allocation0], 256  }
  0x15   :  { %66 = vsyncadd [#allocation0], 4294967040 }
  0x16   :  { %10 = vsyncpa [#allocation0], 1 }
  0x17   :  { %11 = vsyncpa [#allocation1], 0  ;;  %s12_s28 = sshll.u32 %s127_s1, 4  ;;  %s13_s28 = int_to_ptr.vmem [resolvable:$true] %s12_s28 }
  0x18   :  { %s40_s29 = scalar_lea.vmem %s13_s28, 256  ;;  %p45_p11 = scmp.lt.s32.totalorder %s13_s28, %s13_s28 }
  0x19   :  { %p41_p10 = scmp.ne.s32.totalorder %s13_s28, %s40_s29  ;;  %p46_p12 = scmp.lt.s32.totalorder %s40_s29, %s40_s29 }
  0x1b   :  { %p47_p13 = por %p46_p12, %p45_p11 }
  0x1d   :  { %p48_p0 = pnand %p47_p13, %p41_p10 }
  0x1f   :  { %51 = shalt.err (!%p48_p0)  }
  0x20   :  { %p53_p1 = scmp.ne.s32.totalorder %s87_s11, %s32_s0  ;;  %p56_p2 = scmp.lt.u32.totalorder %s32_s0, %s32_s0 }
  0x22   :  { %p57_p3 = por %p56_p2, %p34_p7 }
  0x24   :  { %p59_p4 = por %p57_p3, %p33_p6 }
  0x26   :  { %p60_p5 = pnand %p59_p4, %p53_p1 }
  0x28   :  { %63 = shalt.err (!%p60_p5)  }
  0x29   :  { %15 = dma.vmem_to_hbm [thread:$0]  %s13_s28, 256, %s87_s11, [#allocation1] }
  0x2a   :  { %67 = dma.done.wait [#allocation1], 256  }
  0x2b   :  { %68 = vsyncadd [#allocation1], 4294967040 }
  0x2c   :  { %17 = vsyncpa [#allocation1], 1 }

// kernel: forward.1
= control target key start
LH: loop header
LB: loop body
LE: loop exit
PB: predicated region body
PF: predicated region fallthrough
CT: control target
= control target key end

     0   :  { %v298_v0 = vmov 0   ;;  %v299_v14 = vmov 683565275   ;;  %v300_v16 = vmov 2475754826   ;;  %s368_s0 = inlined_call_operand.vmem [shape: f32[8,1], index: 0, kind: input, shape index: {}]   ;;  %s369_s1 = inlined_call_operand.vmem [shape: f32[2,2,8,8], index: 1, kind: input, shape index: {}, may-alias: {1,2}]   ;;  %s370_s2 = inlined_call_operand.vmem [shape: f32[2,2,8,8], index: 2, kind: output, shape index: {}, may-alias: {1,2}]  }
   0x1   :  { %293 = vset.pattern.permute.xlu1 %v298_v0  ;;  %292 = vset.pattern.permute.xlu0 %v298_v0  ;;  %v11_v1 = vld [vmem:[%s368_s0] sm:$0xff]  ;;  %v301_v18 = vmov 2131351028   ;;  %v302_v20 = vmov 2102212464  }
   0x2   :  { %v323_v2 = vmul.f32 0.5, %v11_v1  ;;  %v303_v22 = vmov 920167782   ;;  %v304_v29 = vmov 1326507024  }
   0x4   :  { %v16_v3 = vand.u32 2139095040, %v323_v2  ;;  %v13_v5 = vand.u32 2147483647, %v323_v2  ;;  %vm15_vm7 = vcmp.lt.s32.totalorder %v323_v2, 0  ;;  %vm105_vm15 = vweird.f32 %v323_v2 }
   0x6   :  { %v17_v4 = vshrl.u32 %v16_v3, 23  ;;  %v20_v8 = vand.u32 8388607, %v13_v5  ;;  %vm14_vm8 = vcmp.le.f32.partialorder %v13_v5, 0.7853982 }
   0x8   :  { %v267_v6 = vadd.s32 4294967169, %v17_v4  ;;  %v21_v11 = vor.u32 8388608, %v20_v8 }
   0xa   :  { %v23_v7 = vadd.s32 1, %v267_v6  ;;  %v61_v31 = vshll.u32 %v21_v11, 8 }
   0xc   :  { %vm24_vm0 = vcmp.gt.s32.totalorder %v23_v7, 0 }
   0xd   :  { %v25_v9 = vsel %vm24_vm0, %v23_v7, 0  ;;  %vm244_vm0 = vcmask 64512  }
   0xe   :  { %v27_v10 = vand.u32 31, %v25_v9  ;;  %v26_v12 = vshrl.u32 %v25_v9, 5 }
  0x10   :  { %v28_v13 = vsub.s32 32, %v27_v10  ;;  %v30_v15 = vshll.u32 %v299_v14, %v27_v10  ;;  %v33_v17 = vshll.u32 %v300_v16, %v27_v10  ;;  %v36_v19 = vshll.u32 %v301_v18, %v27_v10 }
  0x11   :  { %v39_v21 = vshll.u32 %v302_v20, %v27_v10  ;;  %v42_v23 = vshll.u32 %v303_v22, %v27_v10  ;;  %vm45_vm1 = vcmp.lt.s32.totalorder %v26_v12, 1  ;;  %vm48_vm2 = vcmp.lt.s32.totalorder %v26_v12, 4 }
  0x12   :  { %v29_v24 = vshrl.u32 %v299_v14, %v28_v13  ;;  %v31_v25 = vshrl.u32 %v300_v16, %v28_v13  ;;  %v34_v26 = vshrl.u32 %v301_v18, %v28_v13  ;;  %v37_v27 = vshrl.u32 %v302_v20, %v28_v13 }
  0x13   :  { %v40_v28 = vshrl.u32 %v303_v22, %v28_v13  ;;  %v43_v30 = vshrl.u32 %v304_v29, %v28_v13  ;;  %vm46_vm3 = vcmp.lt.s32.totalorder %v26_v12, 2  ;;  %vm47_vm4 = vcmp.lt.s32.totalorder %v26_v12, 3 }
  0x14   :  { %v32_v32 = vor.u32 %v31_v25, %v30_v15  ;;  %v35_v33 = vor.u32 %v34_v26, %v33_v17  ;;  %v38_v34 = vor.u32 %v37_v27, %v36_v19 }
  0x15   :  { %v41_v35 = vor.u32 %v40_v28, %v39_v21  ;;  %v44_v36 = vor.u32 %v43_v30, %v42_v23 }
  0x16   :  { %v49_v37 = vsel %vm45_vm1, %v29_v24, %v32_v32  ;;  %v50_v38 = vsel %vm48_vm2, %v38_v34, 2102212464  ;;  %v53_v39 = vsel %vm45_vm1, %v32_v32, %v35_v33  ;;  %v57_v40 = vsel %vm45_vm1, %v35_v33, %v38_v34 }
  0x17   :  { %v51_v41 = vsel %vm47_vm4, %v35_v33, %v50_v38  ;;  %v54_v42 = vsel %vm48_vm2, %v41_v35, 920167782  ;;  %v58_v43 = vsel %vm48_vm2, %v44_v36, 1326507024  ;;  %v275_v38 = vld [vmem:[%s369_s1 + $0x10] sm:$0xff] }
  0x18   :  { %v55_v44 = vsel %vm47_vm4, %v38_v34, %v54_v42  ;;  %v59_v45 = vsel %vm47_vm4, %v41_v35, %v58_v43  ;;  %v52_v46 = vsel %vm46_vm3, %v49_v37, %v51_v41  ;;  %v220_v37 = vld [vmem:[%s369_s1] sm:$0xff] }
  0x19   :  { %v56_v47 = vsel %vm46_vm3, %v53_v39, %v55_v44  ;;  %v60_v48 = vsel %vm46_vm3, %v57_v40, %v59_v45  ;;  %v68_v53 = vmul.u32 %v61_v31, %v52_v46  ;;  %v277_v39 = vld [vmem:[%s369_s1 + $0x18] sm:$0xff] }
  0x1a   :  { %v329_v49 = vmul.u32.u64.low %v61_v31, %v60_v48  ;;  %v330_v50 = vmul.u32.u64.high %v61_v31, %v60_v48, %v329_v49  ;;  %v332_v51 = vmul.u32.u64.low %v61_v31, %v56_v47  ;;  %v333_v52 = vmul.u32.u64.high %v61_v31, %v56_v47, %v332_v51 }
  0x1c   :  { %vm70_vm5 = vc.u32 %v330_v50, %v332_v51  ;;  %v71_v54 = vadd.s32 1, %v333_v52  ;;  %v69_v1 = vadd.s32 %v332_v51, %v330_v50 }
  0x1e   :  { %v72_v55 = vsel %vm70_vm5, %v71_v54, %v333_v52 }
  0x1f   :  { %v73_v56 = vadd.s32 %v72_v55, %v68_v53 }
  0x21   :  { %v74_v57 = vadd.s32 536870912, %v73_v56 }
  0x23   :  { %v75_v58 = vshrl.u32 %v74_v57, 30 }
  0x25   :  { %v76_v59 = vshll.u32 %v75_v58, 30  ;;  %v99_v15 = vsub.s32 4, %v75_v58 }
  0x27   :  { %v77_v60 = vsub.s32 %v73_v56, %v76_v59  ;;  %v100_v18 = vsel %vm15_vm7, %v99_v15, %v75_v58 }
  0x28   :  { %v102_v21 = vsel %vm14_vm8, 0, %v100_v18 }
  0x29   :  { %v79_v61 = vsub.s32 0, %v77_v60  ;;  %v209_v22 = vadd.s32 3, %v102_v21  ;;  %v106_v24 = vand.u32 3, %v102_v21 }
  0x2b   :  { %v268_v62 = vmin.u32 %v79_v61, %v77_v60  ;;  %v210_v23 = vand.u32 3, %v209_v22  ;;  %vm111_vm10 = vcmp.eq.s32.totalorder %v106_v24, 2  ;;  %vm108_vm12 = vcmp.eq.s32.totalorder %v106_v24, 0 }
  0x2c   :  { %vm107_vm14 = vcmp.lt.s32.totalorder %v106_v24, 2 }
  0x2d   :  { %v81_v63 = vclz %v268_v62  ;;  %vm215_vm9 = vcmp.eq.s32.totalorder %v210_v23, 2  ;;  %vm212_vm11 = vcmp.eq.s32.totalorder %v210_v23, 0  ;;  %vm211_vm13 = vcmp.lt.s32.totalorder %v210_v23, 2 }
  0x2f   :  { %v269_v0 = vadd.s32 4294967294, %v81_v63 }
  0x31   :  { %vm270_vm6 = vcmp.lt.s32.totalorder %v269_v0, 0 }
  0x32   :  { %v84_v3 = vsel %vm270_vm6, 0, %v269_v0 }
  0x33   :  { %v85_v4 = vsub.s32 32, %v84_v3  ;;  %v86_v6 = vshll.u32 %v77_v60, %v84_v3  ;;  %v89_v7 = vsub.s32 4294967266, %v84_v3 }
  0x35   :  { %v87_v8 = vshrl.u32 %v69_v1, %v85_v4  ;;  %v90_v9 = vadd.s32 127, %v89_v7 }
  0x37   :  { %v88_v10 = vor.u32 %v87_v8, %v86_v6  ;;  %v91_v11 = vshll.u32 %v90_v9, 23 }
  0x39   :  { %v92_v12 = vor.u32 4788187, %v91_v11  ;;  %v95_v13 = vcvt.s32.f32 %v88_v10 }
  0x3b   :  { %v93_v14 = vand.u32 2147483647, %v92_v12 }
  0x3d   :  { %v96_v16 = vmul.f32 %v95_v13, %v93_v14 }
  0x3f   :  { %v97_v17 = vxor.u32 2147483648, %v96_v16 }
  0x41   :  { %v98_v19 = vsel %vm15_vm7, %v97_v17, %v96_v16 }
  0x42   :  { %v101_v20 = vsel %vm14_vm8, %v323_v2, %v98_v19  ;;  %v276_v2 = vld [vmem:[%s369_s1 + $0x8] sm:$0xff] }
  0x43   :  { %294 = vcosq.f32 %v101_v20 }
  0x44   :  { %296 = vsinq.f32 %v101_v20 }
  0x4d   :  { %v295_v25 = vpop.eup %294 }
  0x4e   :  { %v297_v26 = vpop.eup %296  ;;  %v112_v27 = vxor.u32 2147483648, %v295_v25 }
  0x4f   :  { %v109_v28 = vxor.u32 2147483648, %v297_v26 }
  0x50   :  { %v217_v5 = vsel %vm215_vm9, %v112_v27, %v297_v26  ;;  %v113_v29 = vsel %vm111_vm10, %v112_v27, %v297_v26 }
  0x51   :  { %v214_v30 = vsel %vm212_vm11, %v295_v25, %v109_v28  ;;  %v110_v31 = vsel %vm108_vm12, %v295_v25, %v109_v28 }
  0x52   :  { %v218_v32 = vsel %vm211_vm13, %v214_v30, %v217_v5  ;;  %v114_v33 = vsel %vm107_vm14, %v110_v31, %v113_v29 }
  0x53   :  { %v219_v34 = vsel %vm105_vm15, nan, %v218_v32  ;;  %v115_v35 = vsel %vm105_vm15, nan, %v114_v33 }
  0x54   :  { %250 = vperm.xlu1 %293, %v219_v34   ;;  %v234_v36 = vsub.f32 0.0, %v219_v34  ;;  %229 = vperm.xlu0 %292, %v115_v35  }
  0x58   :  { %237 = vperm.xlu0 %292, %v234_v36  }
  0xd3   :  { %v251_v40 = vpop.permute.xlu1 %250  ;;  %v230_v41 = vpop.permute.xlu0 %229 }
  0xd4   :  { %v253_v42 = vmul.f32 %v251_v40, %v220_v37  ;;  %v254_v43 = vmul.f32 %v276_v2, %v251_v40  ;;  %v255_v44 = vmul.f32 %v275_v38, %v230_v41  ;;  %v256_v45 = vmul.f32 %v277_v39, %v230_v41 }
  0xd5   :  { %v232_v49 = vmul.f32 %v230_v41, %v220_v37  ;;  %v233_v50 = vmul.f32 %v276_v2, %v230_v41 }
  0xd6   :  { %v257_v46 = vadd.f32 %v255_v44, %v253_v42  ;;  %v258_v47 = vadd.f32 %v256_v45, %v254_v43 }
  0xd7   :  { %v238_v48 = vpop.permute.xlu0 %237 }
  0xd8   :  { %v240_v51 = vmul.f32 %v275_v38, %v238_v48  ;;  %v241_v52 = vmul.f32 %v277_v39, %v238_v48  ;;  %279 = vst.msk [vmem:[%s370_s2 + $0x10] sm:$0xff] %vm244_vm0, %v257_v46  ;;  %280 = vst.msk [vmem:[%s370_s2 + $0x18] sm:$0xff] %vm244_vm0, %v258_v47 }
  0xda   :  { %v242_v53 = vadd.f32 %v240_v51, %v232_v49  ;;  %v243_v54 = vadd.f32 %v241_v52, %v233_v50 }
  0xdc   :  { %245 = vst.msk [vmem:[%s370_s2] sm:$0xff] %vm244_vm0, %v242_v53  ;;  %278 = vst.msk [vmem:[%s370_s2 + $0x8] sm:$0xff] %vm244_vm0, %v243_v54 }

</bundles_post_ra>
